<compile_context>
chip_gen: v7x
topology: tpu7x:2x2x1
jax: 0.10.0
libtpu: 0.0.40
codegen_flags: <defaults>
</compile_context>

<pallas_src>
import functools
import math

import jax
import jax.numpy as jnp
from jax import lax
from jax.experimental import pallas as pl
from jax.experimental.pallas import tpu as pltpu


# ---------------------------------------------------------------------------
# rSoftMax Pallas kernel
#
# PyTorch semantics (cardinal/group-major input, radix-major output):
#   x: (B, C, H, W)
#   x.view(B, groups, radix, -1).transpose(1, 2)   -> (B, radix, groups, rest)
#   softmax over dim=1 (radix)
#   .view(B, -1, 1, 1)                             -> (B, C*H*W, 1, 1)
# ---------------------------------------------------------------------------
def _rsoftmax_kernel(x_ref, o_ref, *, groups, radix, rest):
    # x_ref: (TB, groups*radix*rest)  cardinal-major rows
    # o_ref: (TB, radix*groups*rest)  radix-major rows
    for g in range(groups):
        # Load the radix chunks of this group once, upcast to f32.
        chunks = [
            x_ref[:, pl.ds((g * radix + r) * rest, rest)].astype(jnp.float32)
            for r in range(radix)
        ]
        m = chunks[0]
        for r in range(1, radix):
            m = jnp.maximum(m, chunks[r])
        exps = [jnp.exp(c - m) for c in chunks]
        s = exps[0]
        for r in range(1, radix):
            s = s + exps[r]
        inv = pl.reciprocal(s, approx=True)  # EUP slot; s >= 1 > 0 always
        for r in range(radix):
            o_ref[:, pl.ds((r * groups + g) * rest, rest)] = (
                exps[r] * inv
            ).astype(o_ref.dtype)


def _choose_batch_tile(batch, row_bytes, target_bytes=2 << 20):
    """Largest batch tile whose block stays ~<=2 MiB; don't over-tile tiny inputs."""
    if batch * row_bytes <= target_bytes or batch <= 8:
        return batch
    tb = min(batch, max(8, target_bytes // max(row_bytes, 1)))
    tb -= tb % 8  # keep the sublane dim a multiple of 8
    return max(tb, 8)


def rsoftmax(x, groups=1, radix=2):
    """Pallas rSoftMax.forward.  x: (B, C, H, W) NCHW, group-major channels."""
    B = x.shape[0]
    chw = math.prod(x.shape[1:])
    assert chw % (groups * radix) == 0, "C*H*W must be divisible by groups*radix"
    rest = chw // (groups * radix)

    # Pure row-major reshape: (B, C, H, W) -> (B, C*H*W)
    # (identical memory order to (B, groups, radix, rest)).
    x2 = x.reshape(B, chw)

    tb = _choose_batch_tile(B, chw * 4)  # size by the f32 working copy
    grid = (pl.cdiv(B, tb),)

    out2 = pl.pallas_call(
        functools.partial(_rsoftmax_kernel, groups=groups, radix=radix, rest=rest),
        out_shape=jax.ShapeDtypeStruct((B, chw), x.dtype),
        grid=grid,
        in_specs=[pl.BlockSpec((tb, chw), lambda i: (i, 0))],
        out_specs=pl.BlockSpec((tb, chw), lambda i: (i, 0)),
        compiler_params=pltpu.CompilerParams(
            dimension_semantics=("parallel",),
        ),
    )(x2)

    # Radix-major flatten back to (B, C*H*W, 1, 1) == torch .view(B, -1, 1, 1).
    return out2.reshape(B, chw, 1, 1)


def rsoftmax_ref(x, groups=1, radix=2):
    """Pure-JAX reference with the exact PyTorch rSoftMax math."""
    B = x.shape[0]
    chw = math.prod(x.shape[1:])
    rest = chw // (groups * radix)
    xr = x.reshape(B, groups, radix, rest)
    y = jax.nn.softmax(jnp.transpose(xr, (0, 2, 1, 3)), axis=1)
    return y.reshape(B, chw, 1, 1)


# ---------------------------------------------------------------------------
# SplitAttention forward (JAX glue around the Pallas rSoftMax)
# ---------------------------------------------------------------------------
def _conv2d(x, w, b, *, stride=1, padding=0, dilation=1, groups=1):
    # TODO(synk): grouped Conv2d/BatchNorm have no clean Pallas equivalent here;
    # they use XLA's native convolution (lax.conv_general_dilated).
    out = lax.conv_general_dilated(
        x, w,
        window_strides=(stride, stride),
        padding=[(padding, padding), (padding, padding)],
        rhs_dilation=(dilation, dilation),
        dimension_numbers=("NCHW", "OIHW", "NCHW"),
        feature_group_count=groups,
    )
    if b is not None:
        out = out + b.reshape(1, -1, 1, 1)
    return out


def _batchnorm(x, bn, eps=1e-5):
    gamma, beta, mean, var = bn
    inv = gamma / jnp.sqrt(var + eps)
    return x * inv.reshape(1, -1, 1, 1) + (beta - mean * inv).reshape(1, -1, 1, 1)


def init_split_attention_params(key, in_channels, channels, kernel_size,
                                groups=1, radix=2, reduction_factor=4, bias=True,
                                dtype=jnp.float32):
    inter_channels = max(32, in_channels * radix // reduction_factor)
    ks = jax.random.split(key, 8)

    def norm(k, shape, scale=0.1):
        return scale * jax.random.normal(k, shape, dtype)

    def bn_params(k, c):
        k1, k2, k3, k4 = jax.random.split(k, 4)
        gamma = 1.0 + 0.1 * jax.random.normal(k1, (c,), dtype)
        beta = 0.1 * jax.random.normal(k2, (c,), dtype)
        mean = 0.1 * jax.random.normal(k3, (c,), dtype)
        var = 1.0 + 0.1 * jax.random.uniform(k4, (c,), dtype)
        return (gamma, beta, mean, var)

    return {
        "w_radix": norm(ks[0], (channels * radix, in_channels // (groups * radix),
                                kernel_size, kernel_size)),
        "b_radix": norm(ks[1], (channels * radix,)) if bias else None,
        "bn_radix": bn_params(ks[2], channels * radix),
        "w_att1": norm(ks[3], (inter_channels, channels // groups, 1, 1)),
        "b_att1": norm(ks[4], (inter_channels,)),
        "bn_att": bn_params(ks[5], inter_channels),
        "w_att2": norm(ks[6], (channels * radix, inter_channels // groups, 1, 1)),
        "b_att2": norm(ks[7], (channels * radix,)),
    }


def split_attention_forward(params, x, *, radix=2, groups=1,
                            stride=1, padding=0, dilation=1,
                            rsoftmax_fn=rsoftmax):
    # radix_conv: grouped conv (groups*radix) + BN + ReLU
    h = _conv2d(x, params["w_radix"], params["b_radix"],
                stride=stride, padding=padding, dilation=dilation,
                groups=groups * radix)
    h = jax.nn.relu(_batchnorm(h, params["bn_radix"]))

    B, rC = h.shape[:2]
    ch = rC // radix
    splits = [h[:, i * ch:(i + 1) * ch] for i in range(radix)]
    gap = splits[0]
    for s in splits[1:]:
        gap = gap + s

    # attention: 1x1 grouped conv -> BN -> ReLU -> 1x1 grouped conv (cardinal-major)
    a = _conv2d(gap, params["w_att1"], params["b_att1"], groups=groups)
    a = jax.nn.relu(_batchnorm(a, params["bn_att"]))
    a = _conv2d(a, params["w_att2"], params["b_att2"], groups=groups)

    # radix-softmax (Pallas kernel) -> (B, -1, 1, 1), radix-major
    att = rsoftmax_fn(a, groups=groups, radix=radix)

    # torch.split(att, rC // radix, dim=1); zip keeps the first `radix` chunks
    att_maps = [att[:, i * ch:(i + 1) * ch] for i in range(radix)]
    out = att_maps[0] * splits[0]
    for am, sp in zip(att_maps[1:], splits[1:]):
        out = out + am * sp
    return out


if __name__ == "__main__":
    key = jax.random.PRNGKey(0)
    k_x, k_p, k_s = jax.random.split(key, 3)

    # --- standalone rSoftMax kernel check (groups=2 exercises the reordering) ---
    groups_s, radix_s, rest_s = 2, 2, 128
    xs = jax.random.normal(k_s, (4, groups_s * radix_s * rest_s, 1, 1), jnp.float32)
    ys = jax.block_until_ready(rsoftmax(xs, groups=groups_s, radix=radix_s))
    ys_ref = rsoftmax_ref(xs, groups=groups_s, radix=radix_s)
    assert ys.shape == ys_ref.shape, (ys.shape, ys_ref.shape)
    assert jnp.allclose(ys, ys_ref, atol=5e-3, rtol=5e-3), "rsoftmax mismatch"

    # --- full SplitAttention forward using the Pallas rSoftMax ---
    B, in_channels, H, W = 2, 4, 16, 16
    channels, kernel_size, padding = 8, 3, 1
    groups, radix = 1, 2

    x = jax.random.normal(k_x, (B, in_channels, H, W), jnp.float32)
    params = init_split_attention_params(k_p, in_channels, channels, kernel_size,
                                         groups=groups, radix=radix)

    out = split_attention_forward(params, x, radix=radix, groups=groups,
                                  padding=padding)
    out = jax.block_until_ready(out)

    out_ref = split_attention_forward(params, x, radix=radix, groups=groups,
                                      padding=padding, rsoftmax_fn=rsoftmax_ref)
    out_ref = jax.block_until_ready(out_ref)

    assert out.shape == (B, channels, H, W), out.shape
    assert jnp.allclose(out, out_ref, atol=5e-3, rtol=5e-3), "SplitAttention mismatch"

    print("KERNEL_OK")
</pallas_src>

<mosaic_0001>
module attributes {stable_mosaic.version = 11 : i64} {
  func.func @_rsoftmax_kernel(%arg0: i32, %arg1: memref<4x512xf32, #tpu.memory_space<vmem>>, %arg2: memref<4x512xf32, #tpu.memory_space<vmem>>) attributes {dimension_semantics = [#tpu.dimension_semantics<parallel>], iteration_bounds = array<i64: 1>, scalar_prefetch = 0 : i64, scratch_operands = 0 : i64, tpu.core_type = #tpu.core_type<tc>, window_params = [{transform_indices = @transform_0, window_bounds = array<i64: 4, 512>}, {transform_indices = @transform_1, window_bounds = array<i64: 4, 512>}]} {
    %c0 = arith.constant 0 : index
    %c0_0 = arith.constant 0 : index
    %0 = vector.load %arg1[%c0, %c0_0] : memref<4x512xf32, #tpu.memory_space<vmem>>, vector<4x128xf32>
    %c0_1 = arith.constant 0 : index
    %c128 = arith.constant 128 : index
    %1 = vector.load %arg1[%c0_1, %c128] : memref<4x512xf32, #tpu.memory_space<vmem>>, vector<4x128xf32>
    %2 = arith.maximumf %0, %1 : vector<4x128xf32>
    %3 = arith.subf %0, %2 : vector<4x128xf32>
    %4 = math.exp %3 : vector<4x128xf32>
    %5 = arith.subf %1, %2 : vector<4x128xf32>
    %6 = math.exp %5 : vector<4x128xf32>
    %7 = arith.addf %4, %6 : vector<4x128xf32>
    %8 = tpu.reciprocal %7 {approx = true} : vector<4x128xf32> -> vector<4x128xf32>
    %9 = arith.mulf %4, %8 : vector<4x128xf32>
    %c0_2 = arith.constant 0 : index
    %c0_3 = arith.constant 0 : index
    %10 = vector.load %arg2[%c0_2, %c0_3] : memref<4x512xf32, #tpu.memory_space<vmem>>, vector<4x128xf32>
    tpu.vector_store %arg2[%c0_2, %c0_3], %9 {strides = array<i32>} : memref<4x512xf32, #tpu.memory_space<vmem>>, vector<4x128xf32>,
    %11 = arith.mulf %6, %8 : vector<4x128xf32>
    %c0_4 = arith.constant 0 : index
    %c256 = arith.constant 256 : index
    %12 = vector.load %arg2[%c0_4, %c256] : memref<4x512xf32, #tpu.memory_space<vmem>>, vector<4x128xf32>
    tpu.vector_store %arg2[%c0_4, %c256], %11 {strides = array<i32>} : memref<4x512xf32, #tpu.memory_space<vmem>>, vector<4x128xf32>,
    %c0_5 = arith.constant 0 : index
    %c256_6 = arith.constant 256 : index
    %13 = vector.load %arg1[%c0_5, %c256_6] : memref<4x512xf32, #tpu.memory_space<vmem>>, vector<4x128xf32>
    %c0_7 = arith.constant 0 : index
    %c384 = arith.constant 384 : index
    %14 = vector.load %arg1[%c0_7, %c384] : memref<4x512xf32, #tpu.memory_space<vmem>>, vector<4x128xf32>
    %15 = arith.maximumf %13, %14 : vector<4x128xf32>
    %16 = arith.subf %13, %15 : vector<4x128xf32>
    %17 = math.exp %16 : vector<4x128xf32>
    %18 = arith.subf %14, %15 : vector<4x128xf32>
    %19 = math.exp %18 : vector<4x128xf32>
    %20 = arith.addf %17, %19 : vector<4x128xf32>
    %21 = tpu.reciprocal %20 {approx = true} : vector<4x128xf32> -> vector<4x128xf32>
    %22 = arith.mulf %17, %21 : vector<4x128xf32>
    %c0_8 = arith.constant 0 : index
    %c128_9 = arith.constant 128 : index
    %23 = vector.load %arg2[%c0_8, %c128_9] : memref<4x512xf32, #tpu.memory_space<vmem>>, vector<4x128xf32>
    tpu.vector_store %arg2[%c0_8, %c128_9], %22 {strides = array<i32>} : memref<4x512xf32, #tpu.memory_space<vmem>>, vector<4x128xf32>,
    %24 = arith.mulf %19, %21 : vector<4x128xf32>
    %c0_10 = arith.constant 0 : index
    %c384_11 = arith.constant 384 : index
    %25 = vector.load %arg2[%c0_10, %c384_11] : memref<4x512xf32, #tpu.memory_space<vmem>>, vector<4x128xf32>
    tpu.vector_store %arg2[%c0_10, %c384_11], %24 {strides = array<i32>} : memref<4x512xf32, #tpu.memory_space<vmem>>, vector<4x128xf32>,
    return
  }
  func.func @transform_0(%arg0: i32) -> (i32, i32) {
    %c0_i32 = arith.constant 0 : i32
    %c0_i32_0 = arith.constant 0 : i32
    return %arg0, %c0_i32 : i32, i32
  }
  func.func @transform_1(%arg0: i32) -> (i32, i32) {
    %c0_i32 = arith.constant 0 : i32
    %c0_i32_0 = arith.constant 0 : i32
    return %arg0, %c0_i32 : i32, i32
  }
}

</mosaic_0001>

<bundles_post_ra>
// kernel: tpu_custom_call.1
= control target key start
LH: loop header
LB: loop body
LE: loop exit
PB: predicated region body
PF: predicated region fallthrough
CT: control target
= control target key end

     0   :  { %6 = vsyncpa [#allocation3], 0  ;;  %s164_s0 = inlined_call_operand.hbm [shape: f32[4,512], index: 0, kind: input, shape index: {}]   ;;  %s165_s1 = inlined_call_operand.hbm [shape: f32[4,512], index: 1, kind: output, shape index: {}]  }
   0x1   :  { %7 = vsyncpa [#allocation4], 0  ;;  %s128_s6 = smov [#allocation2]   ;;  %s80_s10 = scalar_lea.hbm %s164_s0, 256 }
   0x2   :  { %s14_s7 = sshll.u32 %s128_s6, 4  ;;  %p81_p0 = scmp.ne.s32.totalorder %s164_s0, %s80_s10  ;;  %s15_s7 = int_to_ptr.vmem [resolvable:$true] %s14_s7 }
   0x3   :  { %p84_p1 = scmp.lt.u32.totalorder %s80_s10, %s164_s0 }
   0x5   :  { %p86_p2 = pnand %p84_p1, %p81_p0 }
   0x7   :  { %89 = shalt.err (!%p86_p2)
}
   0x8   :  { %s90_s15 = scalar_lea.vmem %s15_s7, 256  ;;  %p95_p4 = scmp.lt.s32.totalorder %s15_s7, %s15_s7 }
   0x9   :  { %p91_p3 = scmp.ne.s32.totalorder %s15_s7, %s90_s15  ;;  %p96_p5 = scmp.lt.s32.totalorder %s90_s15, %s90_s15 }
   0xb   :  { %p97_p6 = por %p96_p5, %p95_p4 }
   0xd   :  { %p98_p7 = pnand %p97_p6, %p91_p3 }
   0xf   :  { %101 = shalt.err (!%p98_p7)
}
  0x10   :  { %17 = dma.hbm_to_vmem [thread:$0]  %s164_s0, 256, %s15_s7, [#allocation3]  }
  0x11   :  { %124 = dma.done.wait [#allocation3], 256  }
  0x12   :  { %125 = vsyncadd [#allocation3], 4294967040  ;;  %v21_v0 = vld [vmem:[#allocation2] sm:$0xf]  ;;  %v22_v1 = vld [vmem:[#allocation2 + $0x4] sm:$0xf] }
  0x13   :  { %v36_v2 = vld [vmem:[#allocation2 + $0x8] sm:$0xf]  ;;  %v23_v3 = vmax.f32 %v21_v0, %v22_v1  ;;  %v37_v4 = vld [vmem:[#allocation2 + $0xc] sm:$0xf]  ;;  %s129_s0 = smov [#allocation5]  }
  0x14   :  { %v38_v5 = vmax.f32 %v36_v2, %v37_v4  ;;  %s57_s18 = sshll.u32 %s129_s0, 4  ;;  %s58_s18 = int_to_ptr.vmem [resolvable:$true] %s57_s18 }
  0x15   :  { %v24_v6 = vsub.f32 %v21_v0, %v23_v3  ;;  %v27_v7 = vsub.f32 %v22_v1, %v23_v3  ;;  %s102_s19 = scalar_lea.vmem %s58_s18, 256  ;;  %p107_p9 = scmp.lt.s32.totalorder %s58_s18, %s58_s18 }
  0x16   :  { %v39_v8 = vsub.f32 %v36_v2, %v38_v5  ;;  %v42_v9 = vsub.f32 %v37_v4, %v38_v5  ;;  %p103_p8 = scmp.ne.s32.totalorder %s58_s18, %s102_s19  ;;  %p108_p10 = scmp.lt.s32.totalorder %s102_s19, %s102_s19 }
  0x17   :  { %v25_v10 = vmul.f32 1.442695, %v24_v6  ;;  %v28_v11 = vmul.f32 1.442695, %v27_v7 }
  0x18   :  { %v40_v12 = vmul.f32 1.442695, %v39_v8  ;;  %v43_v13 = vmul.f32 1.442695, %v42_v9  ;;  %p109_p11 = por %p108_p10, %p107_p9 }
  0x19   :  { %68 = vpow2.f32 %v25_v10 }
  0x1a   :  { %70 = vpow2.f32 %v28_v11  ;;  %p110_p12 = pnand %p109_p11, %p103_p8 }
  0x1b   :  { %72 = vpow2.f32 %v40_v12 }
  0x1c   :  { %74 = vpow2.f32 %v43_v13 }
  0x23   :  { %v69_v14 = vpop.eup %68 }
  0x24   :  { %v71_v15 = vpop.eup %70 }
  0x25   :  { %v73_v16 = vpop.eup %72  ;;  %v30_v17 = vadd.f32 %v71_v15, %v69_v14 }
  0x26   :  { %v75_v18 = vpop.eup %74 }
  0x27   :  { %76 = vrcp.f32 %v30_v17  ;;  %v45_v19 = vadd.f32 %v75_v18, %v73_v16 }
  0x29   :  { %78 = vrcp.f32 %v45_v19 }
  0x31   :  { %v77_v20 = vpop.eup %76 }
  0x32   :  { %v32_v21 = vmul.f32 %v77_v20, %v69_v14  ;;  %v34_v22 = vmul.f32 %v77_v20, %v71_v15 }
  0x33   :  { %v79_v23 = vpop.eup %78 }
  0x34   :  { %33 = vst [vmem:[#allocation5] sm:$0xf] %v32_v21  ;;  %35 = vst [vmem:[#allocation5 + $0x8] sm:$0xf] %v34_v22  ;;  %v47_v24 = vmul.f32 %v79_v23, %v73_v16  ;;  %v49_v25 = vmul.f32 %v79_v23, %v75_v18 }
  0x36   :  { %48 = vst [vmem:[#allocation5 + $0x4] sm:$0xf] %v47_v24  ;;  %50 = vst [vmem:[#allocation5 + $0xc] sm:$0xf] %v49_v25 }
  0x37   :  { %113 = shalt.err (!%p110_p12)
}
  0x38   :  { %s114_s22 = scalar_lea.hbm %s165_s1, 256 }
  0x39   :  { %p115_p13 = scmp.ne.s32.totalorder %s165_s1, %s114_s22  ;;  %p118_p0 = scmp.lt.u32.totalorder %s114_s22, %s165_s1 }
  0x3b   :  { %p120_p1 = pnand %p118_p0, %p115_p13 }
  0x3d   :  { %123 = shalt.err (!%p120_p1)
}
  0x3e   :  { %60 = dma.vmem_to_hbm [thread:$0]  %s58_s18, 256, %s165_s1, [#allocation4]  }
  0x3f   :  { %126 = dma.done.wait [#allocation4], 256  }
  0x40   :  { %127 = vsyncadd [#allocation4], 4294967040 }
  0x41   :  { %64 = vsyncpa [#allocation3], 1 }
  0x42   :  { %65 = vsyncpa [#allocation4], 1 }

</bundles_post_ra>
